<compile_context>
chip_gen: v7x
topology: tpu7x:2x2x1
jax: 0.10.0
libtpu: 0.0.40
codegen_flags: <defaults>
</compile_context>

<pallas_src>
import functools

import jax
import jax.numpy as jnp
from jax.experimental import pallas as pl
from jax.experimental.pallas import tpu as pltpu


def _conv2x2_flat_kernel(w_ref, b_ref, x_ref, o_ref, *, width, hw_pad):
    # Hoisted scalar reads (SMEM, 32-bit scalar path): once per grid step.
    w00 = w_ref[0, 0]
    w01 = w_ref[0, 1]
    w10 = w_ref[1, 0]
    w11 = w_ref[1, 1]
    b = b_ref[0]

    x = x_ref[...]                               # (TB, HWp) full flat block
    # Right neighbour x[i, j+1] via one static lane rotation (XLU slot).
    x_r = pltpu.roll(x, hw_pad - 1, 1)

    # Factor the bottom-row term so only ONE additional roll is needed:
    #   top[f]                 = w00*x[i, j]   + w01*x[i, j+1]
    #   bot[f]                 = w10*x[i, j]   + w11*x[i, j+1]
    #   roll(bot, hw-W)[f]     = w10*x[i+1, j] + w11*x[i+1, j+1]
    # Wrap-around from both rolls lands only in each image's last row /
    # last column (and the lane pad tail), all of which the wrapper crops.
    top = w00 * x + w01 * x_r
    bot = w10 * x + w11 * x_r
    acc = top + pltpu.roll(bot, hw_pad - width, 1) + b
    o_ref[...] = acc.astype(o_ref.dtype)         # full-width unmasked store


def _vmem_budget_bytes():
    """Per-generation budget for the ~4x (double-buffered in+out) block set."""
    cap = None
    try:
        cap = getattr(pltpu.get_tpu_info(), "vmem_capacity_bytes", None)
    except Exception:
        cap = None
    if cap is not None and cap >= (96 << 20):
        return 20 << 20          # v5e / v6e: 128 MiB physical VMEM
    return 12 << 20              # v7x (64 MiB physical) / unknown: conservative


def _pick_batch_tile(n, hw_pad, itemsize, budget_bytes):
    """Return (TB, n_pad).

    TB divides n_pad, is a multiple of the dtype's sublane granularity, keeps
    ~4x block bytes inside the VMEM budget, and — when the batch is big
    enough — yields >= 4 grid steps so the software pipeline actually overlaps
    DMA with compute (and v7x's 2 TensorCores both get grid steps).
    """
    sub = max(8, 32 // itemsize)          # 8 rows f32, 16 bf16, 32 int8
    if n <= 2 * sub:
        return n, n                       # tiny batch: one full block, no pad
    n_pad = pl.cdiv(n, sub) * sub         # pad only to sublane granularity
    bytes_per_row = hw_pad * itemsize
    max_rows = max(sub, ((budget_bytes // (4 * bytes_per_row)) // sub) * sub)
    min_steps = 4
    target = min(max_rows, max(sub, ((n_pad // min_steps) // sub) * sub))
    # Largest multiple of `sub` <= target that divides n_pad (=> no extra pad).
    tb = sub
    t = (target // sub) * sub
    while t >= sub:
        if n_pad % t == 0:
            tb = t
            break
        t -= sub
    return tb, n_pad


def conv2d_1ch_k2(x_nchw, weight, bias):
    """Conv2d(1, 1, kernel_size=2, stride=1, padding=0) via a Pallas kernel.

    x_nchw: (N, 1, H, W);  weight: (2, 2);  bias: (1,)  ->  (N, 1, H-1, W-1)
    """
    N, C, H, W = x_nchw.shape
    assert C == 1, "module is Conv2d(1, 1, ...)"
    Ho, Wo = H - 1, W - 1
    HW = H * W
    dtype = x_nchw.dtype
    itemsize = jnp.dtype(dtype).itemsize

    # SMEM scalar path is 32-bit: keep weights/bias in f32.
    weight = jnp.asarray(weight, jnp.float32).reshape(2, 2)
    bias = jnp.asarray(bias, jnp.float32).reshape(1)

    # Free layout plumbing: (N,1,H,W) -> (N, H*W) (metadata-only reshape).
    # Pad the lane dim to a multiple of 128 only if needed so stores stay
    # unmasked; for 16x16 images (HW = 256) this is a no-op.
    hw_pad = pl.cdiv(HW, 128) * 128
    x = x_nchw.reshape(N, HW)
    if hw_pad != HW:
        x = jnp.pad(x, ((0, 0), (0, hw_pad - HW)))

    budget = _vmem_budget_bytes()
    TB, n_pad = _pick_batch_tile(N, hw_pad, itemsize, budget)
    if n_pad != N:  # only hit when N is not a multiple of the sublane count
        x = jnp.pad(x, ((0, n_pad - N), (0, 0)))
    grid = (n_pad // TB,)

    cost = pl.CostEstimate(
        flops=8 * n_pad * HW,                    # 4 mul + 4 add per pixel
        transcendentals=0,
        bytes_accessed=2 * n_pad * hw_pad * itemsize
        + (weight.size + bias.size) * 4,
    )

    out_flat = pl.pallas_call(
        functools.partial(_conv2x2_flat_kernel, width=W, hw_pad=hw_pad),
        out_shape=jax.ShapeDtypeStruct((n_pad, hw_pad), dtype),
        grid_spec=pltpu.PrefetchScalarGridSpec(
            num_scalar_prefetch=0,
            grid=grid,
            in_specs=[
                pl.BlockSpec(memory_space=pltpu.SMEM),        # (2,2) weights
                pl.BlockSpec(memory_space=pltpu.SMEM),        # (1,)  bias
                pl.BlockSpec((TB, hw_pad), lambda n: (n, 0)),  # flat images
            ],
            out_specs=pl.BlockSpec((TB, hw_pad), lambda n: (n, 0)),
        ),
        compiler_params=pltpu.CompilerParams(
            dimension_semantics=("parallel",),   # shards grid over 2 TCs (v7x)
            vmem_limit_bytes=int(budget + (4 << 20)),
        ),
        cost_estimate=cost,
    )(weight, bias, x)

    # Module contract: valid-conv crop.  NOTE: padded batch rows hold the bias
    # value (not zero), so the [:N] slice must stay if this is refactored.
    # Downstream consumers can fuse this slice; under jit it is one copy.
    out = out_flat[:N, :HW].reshape(N, H, W)[:, :Ho, :Wo]
    return out.reshape(N, 1, Ho, Wo)


if __name__ == "__main__":
    # Deterministic parameters, exactly as set in the module's __init__:
    weight = jnp.array([[0.0, 0.0], [0.0, 0.0]], dtype=jnp.float32)  # (2, 2)
    bias = jnp.zeros((1,), dtype=jnp.float32)

    # Deterministic small input, NCHW with 1 channel.
    key = jax.random.PRNGKey(0)
    x = jax.random.normal(key, (2, 1, 16, 16), dtype=jnp.float32)

    out = conv2d_1ch_k2(x, weight, bias)
    out = jax.block_until_ready(out)

    # Module-faithful check: zero weight + zero bias -> all-zero output.
    assert out.shape == (2, 1, 15, 15), out.shape
    assert bool(jnp.allclose(out, jnp.zeros_like(out)))

    # General-weights check against a pure-JAX reference (verifies the
    # factored two-roll formulation, not just the degenerate zero case).
    w2 = jnp.array([[1.0, -2.0], [3.0, 0.5]], dtype=jnp.float32)
    b2 = jnp.array([0.25], dtype=jnp.float32)

    def ref_conv(xi4, w, b):
        xi = xi4[:, 0]
        r = (w[0, 0] * xi[:, :-1, :-1] + w[0, 1] * xi[:, :-1, 1:]
             + w[1, 0] * xi[:, 1:, :-1] + w[1, 1] * xi[:, 1:, 1:] + b[0])
        return r[:, None, :, :]

    got = jax.block_until_ready(conv2d_1ch_k2(x, w2, b2))
    assert bool(jnp.allclose(got, ref_conv(x, w2, b2), atol=1e-5, rtol=1e-5))

    # Multi-step-grid check (exercises the tiled / pipelined path, TB | N).
    x_big = jax.random.normal(jax.random.PRNGKey(1), (48, 1, 16, 16),
                              dtype=jnp.float32)
    got_big = jax.block_until_ready(conv2d_1ch_k2(x_big, w2, b2))
    assert got_big.shape == (48, 1, 15, 15), got_big.shape
    assert bool(jnp.allclose(got_big, ref_conv(x_big, w2, b2),
                             atol=1e-5, rtol=1e-5))

    print("KERNEL_OK")
</pallas_src>

<mosaic_0001>
module attributes {stable_mosaic.version = 11 : i64} {
  func.func @_conv2x2_flat_kernel(%arg0: i32, %arg1: memref<2x2xf32, #tpu.memory_space<smem>>, %arg2: memref<1xf32, #tpu.memory_space<smem>>, %arg3: memref<2x256xf32, #tpu.memory_space<vmem>>, %arg4: memref<2x256xf32, #tpu.memory_space<vmem>>) attributes {dimension_semantics = [#tpu.dimension_semantics<parallel>], iteration_bounds = array<i64: 1>, scalar_prefetch = 0 : i64, scratch_operands = 0 : i64, tpu.core_type = #tpu.core_type<tc>, window_params = [{transform_indices = @transform_0, window_bounds = array<i64: 2, 2>}, {transform_indices = @transform_1, window_bounds = array<i64: 1>}, {transform_indices = @transform_2, window_bounds = array<i64: 2, 256>}, {transform_indices = @transform_3, window_bounds = array<i64: 2, 256>}]} {
    %c0 = arith.constant 0 : index
    %c0_0 = arith.constant 0 : index
    %0 = memref.load %arg1[%c0, %c0_0] : memref<2x2xf32, #tpu.memory_space<smem>>
    %c0_1 = arith.constant 0 : index
    %c1 = arith.constant 1 : index
    %1 = memref.load %arg1[%c0_1, %c1] : memref<2x2xf32, #tpu.memory_space<smem>>
    %c1_2 = arith.constant 1 : index
    %c0_3 = arith.constant 0 : index
    %2 = memref.load %arg1[%c1_2, %c0_3] : memref<2x2xf32, #tpu.memory_space<smem>>
    %c1_4 = arith.constant 1 : index
    %c1_5 = arith.constant 1 : index
    %3 = memref.load %arg1[%c1_4, %c1_5] : memref<2x2xf32, #tpu.memory_space<smem>>
    %c0_6 = arith.constant 0 : index
    %4 = memref.load %arg2[%c0_6] : memref<1xf32, #tpu.memory_space<smem>>
    %c0_7 = arith.constant 0 : index
    %c0_8 = arith.constant 0 : index
    %5 = vector.load %arg3[%c0_7, %c0_8] : memref<2x256xf32, #tpu.memory_space<vmem>>, vector<2x256xf32>
    %c255_i32 = arith.constant 255 : i32
    %6 = tpu.dynamic_rotate %5 by %c255_i32 dim 1 : vector<2x256xf32>, i32 -> vector<2x256xf32>
    %7 = vector.broadcast %0 : f32 to vector<2x256xf32>
    %8 = arith.mulf %7, %5 : vector<2x256xf32>
    %9 = vector.broadcast %1 : f32 to vector<2x256xf32>
    %10 = arith.mulf %9, %6 : vector<2x256xf32>
    %11 = arith.addf %8, %10 : vector<2x256xf32>
    %12 = vector.broadcast %2 : f32 to vector<2x256xf32>
    %13 = arith.mulf %12, %5 : vector<2x256xf32>
    %14 = vector.broadcast %3 : f32 to vector<2x256xf32>
    %15 = arith.mulf %14, %6 : vector<2x256xf32>
    %16 = arith.addf %13, %15 : vector<2x256xf32>
    %c240_i32 = arith.constant 240 : i32
    %17 = tpu.dynamic_rotate %16 by %c240_i32 dim 1 : vector<2x256xf32>, i32 -> vector<2x256xf32>
    %18 = arith.addf %11, %17 : vector<2x256xf32>
    %19 = vector.broadcast %4 : f32 to vector<2x256xf32>
    %20 = arith.addf %18, %19 : vector<2x256xf32>
    %c0_9 = arith.constant 0 : index
    %c0_10 = arith.constant 0 : index
    %21 = vector.load %arg4[%c0_9, %c0_10] : memref<2x256xf32, #tpu.memory_space<vmem>>, vector<2x256xf32>
    tpu.vector_store %arg4[%c0_9, %c0_10], %20 {strides = array<i32>} : memref<2x256xf32, #tpu.memory_space<vmem>>, vector<2x256xf32>,
    return
  }
  func.func @transform_0(%arg0: i32) -> (i32, i32) {
    %c0_i32 = arith.constant 0 : i32
    %c0_i32_0 = arith.constant 0 : i32
    %c0_i32_1 = arith.constant 0 : i32
    return %c0_i32, %c0_i32_0 : i32, i32
  }
  func.func @transform_1(%arg0: i32) -> i32 {
    %c0_i32 = arith.constant 0 : i32
    %c0_i32_0 = arith.constant 0 : i32
    return %c0_i32 : i32
  }
  func.func @transform_2(%arg0: i32) -> (i32, i32) {
    %c0_i32 = arith.constant 0 : i32
    %c0_i32_0 = arith.constant 0 : i32
    return %arg0, %c0_i32 : i32, i32
  }
  func.func @transform_3(%arg0: i32) -> (i32, i32) {
    %c0_i32 = arith.constant 0 : i32
    %c0_i32_0 = arith.constant 0 : i32
    return %arg0, %c0_i32 : i32, i32
  }
}

</mosaic_0001>

<bundles_post_ra>
// kernel: tpu_custom_call.1
= control target key start
LH: loop header
LB: loop body
LE: loop exit
PB: predicated region body
PF: predicated region fallthrough
CT: control target
= control target key end

     0   :  { %9 = vsyncpa [#allocation5], 0  ;;  %s229_s0 = inlined_call_operand.vmem [shape: f32[2,2], index: 0, kind: input, shape index: {}]   ;;  %s230_s1 = inlined_call_operand.<no memory space> [shape: f32[1], index: 1, kind: input, shape index: {}]   ;;  %s231_s2 = inlined_call_operand.vmem [shape: f32[2,256], index: 2, kind: input, shape index: {}]   ;;  %s232_s3 = inlined_call_operand.hbm [shape: f32[2,256], index: 3, kind: output, shape index: {}]  }
   0x1   :  { %10 = vsyncpa [#allocation4], 0  ;;  %s17_s14 = sshll.u32 %s229_s0, 4  ;;  %s18_s14 = int_to_ptr.vmem [resolvable:$true] %s17_s14 }
   0x2   :  { %s145_s15 = scalar_lea.vmem %s18_s14, 32  ;;  %p150_p1 = scmp.lt.s32.totalorder %s18_s14, %s18_s14 }
   0x3   :  { %p146_p0 = scmp.ne.s32.totalorder %s18_s14, %s145_s15  ;;  %p151_p2 = scmp.lt.s32.totalorder %s145_s15, %s145_s15 }
   0x5   :  { %p152_p3 = por %p151_p2, %p150_p1 }
   0x7   :  { %p153_p4 = pnand %p152_p3, %p146_p0 }
   0x9   :  { %156 = shalt.err (!%p153_p4)
}
   0xa   :  { %s183_s16 = smov [#allocation3]  }
   0xb   :  { %20 = dma.vmem_to_smem %s18_s14, 32, %s183_s16, [#allocation5]  }
   0xc   :  { %179 = dma.done.wait [#allocation5], 32  }
   0xd   :  { %180 = vsyncadd [#allocation5], 4294967264 }
   0xe   :  { %28 = sfence }
   0xf   :  { %v39_v0 = vlaneseq  ;;  %v184_v1 = vmov 1983009808   ;;  %v34_v5 = vld [vmem:[%s231_s2] sm:$0xf]  ;;  %s185_s18 = smov 127   ;;  %s137_s19 = sld [smem:[#allocation3 + $0x1]]  ;;  %v119_v38 = vstv %s230_s1 }
  0x10   :  { %v37_v2 = vunpack.c.l.s4 %v184_v1  ;;  %s139_s20 = sld [smem:[#allocation3 + $0x81]]  ;;  %s29_s21 = sld [smem:[#allocation3]] }
  0x11   :  { %v40_v3 = vshrl.u32 %v39_v0, 7  ;;  %s138_s22 = sld [smem:[#allocation3 + $0x80]]  ;;  %v51_v9 = vand.u32 127, %v39_v0  ;;  %s186_s2 = smov 112  }
  0x12   :  { %v38_v4 = vunpack.c.0.s8 %v37_v2  ;;  %s187_s25 = smov [#allocation6]  }
  0x13   :  { %vm52_vm0 = vcmp.lt.s32.totalorder %v51_v9, 127  ;;  %vm104_vm1 = vcmp.lt.s32.totalorder %v51_v9, 112  ;;  %s128_s26 = sshll.u32 %s187_s25, 4  ;;  %s129_s26 = int_to_ptr.vmem [resolvable:$true] %s128_s26 }
  0x14   :  { %v41_v6 = vsub.s32 %v38_v4, %v40_v3  ;;  %s157_s27 = scalar_lea.vmem %s129_s26, 64  ;;  %p162_p6 = scmp.lt.s32.totalorder %s129_s26, %s129_s26 }
  0x15   :  { %v57_v11 = vstv %s137_s19  ;;  %p158_p5 = scmp.ne.s32.totalorder %s129_s26, %s157_s27  ;;  %p163_p7 = scmp.lt.s32.totalorder %s157_s27, %s157_s27 }
  0x16   :  { %v42_v7 = vrot.slane %v34_v5, %v41_v6  ;;  %v74_v12 = vstv %s139_s20  ;;  %v55_v14 = vstv %s29_s21 }
  0x17   :  { %v72_v17 = vstv %s138_s22  ;;  %v56_v22 = vmul.f32 %v55_v14, %v34_v5  ;;  %p164_p8 = por %p163_p7, %p162_p6 }
  0x18   :  { %46 = vrot.lane.b32.xlu0 %v42_v7, %s185_s18  ;;  %v43_v8 = vcombine.high %v42_v7, %v42_v7  ;;  %v73_v25 = vmul.f32 %v72_v17, %v34_v5 }
  0x19   :  { %p165_p9 = pnand %p164_p8, %p158_p5 }
  0x1c   :  { %48 = vrot.lane.b32.xlu0 %v43_v8, %s185_s18 }
  0x8a   :  { %v47_v10 = vpop.permute.xlu0 %46 }
  0x8e   :  { %v49_v13 = vpop.permute.xlu0 %48 }
  0x8f   :  { %v53_v15 = vsel %vm52_vm0, %v47_v10, %v49_v13  ;;  %v54_v16 = vsel %vm52_vm0, %v49_v13, %v47_v10 }
  0x90   :  { %v58_v18 = vmul.f32 %v57_v11, %v53_v15  ;;  %v59_v19 = vmul.f32 %v57_v11, %v54_v16  ;;  %v75_v20 = vmul.f32 %v74_v12, %v53_v15  ;;  %v76_v21 = vmul.f32 %v74_v12, %v54_v16 }
  0x92   :  { %v62_v23 = vcombine.low %v58_v18, %v59_v19  ;;  %v79_v24 = vcombine.low %v75_v20, %v76_v21 }
  0x94   :  { %v69_v26 = vrot.slane %v62_v23, %v41_v6  ;;  %v86_v27 = vrot.slane %v79_v24, %v41_v6 }
  0x96   :  { %v88_v28 = vadd.f32 %v86_v27, %v73_v25  ;;  %v71_v29 = vadd.f32 %v69_v26, %v56_v22 }
  0x98   :  { %v96_v30 = vrot.slane %v88_v28, %v41_v6 }
  0x9a   :  { %100 = vrot.lane.b32.xlu1 %v96_v30, %s186_s2  ;;  %v97_v31 = vcombine.high %v96_v30, %v96_v30 }
  0x9e   :  { %102 = vrot.lane.b32.xlu1 %v97_v31, %s186_s2 }
 0x10c   :  { %v101_v32 = vpop.permute.xlu1 %100 }
 0x110   :  { %v103_v33 = vpop.permute.xlu1 %102 }
 0x111   :  { %v105_v34 = vsel %vm104_vm1, %v101_v32, %v103_v33  ;;  %v106_v35 = vsel %vm104_vm1, %v103_v33, %v101_v32 }
 0x112   :  { %v109_v36 = vcombine.low %v105_v34, %v106_v35 }
 0x114   :  { %v116_v37 = vrot.slane %v109_v36, %v41_v6 }
 0x116   :  { %v118_v39 = vadd.f32 %v116_v37, %v71_v29 }
 0x118   :  { %v120_v40 = vadd.f32 %v119_v38, %v118_v39 }
 0x11a   :  { %121 = vst [vmem:[#allocation6] sm:$0xf] %v120_v40 }
 0x11b   :  { %168 = shalt.err (!%p165_p9)
}
 0x11c   :  { %s169_s30 = scalar_lea.hbm %s232_s3, 64 }
 0x11d   :  { %p170_p10 = scmp.ne.s32.totalorder %s232_s3, %s169_s30  ;;  %p173_p11 = scmp.lt.u32.totalorder %s169_s30, %s232_s3 }
 0x11f   :  { %p175_p12 = pnand %p173_p11, %p170_p10 }
 0x121   :  { %178 = shalt.err (!%p175_p12)
}
 0x122   :  { %131 = dma.vmem_to_hbm [thread:$0]  %s129_s26, 64, %s232_s3, [#allocation4]  }
 0x123   :  { %181 = dma.done.wait [#allocation4], 64  }
 0x124   :  { %182 = vsyncadd [#allocation4], 4294967232 }
 0x125   :  { %135 = vsyncpa [#allocation4], 1 }
 0x126   :  { %136 = vsyncpa [#allocation5], 1 }

</bundles_post_ra>
